<compile_context>
chip_gen: v5e
topology: v5e:2x2
jax: 0.10.0
libtpu: 0.0.40
codegen_flags: <defaults>
</compile_context>

<pallas_src>
import math
from functools import partial

import jax
import jax.numpy as jnp
from jax.experimental import pallas as pl
from jax.experimental.pallas import tpu as pltpu

EPS = 1e-6
_VMEM_CAP = 64 * 1024 * 1024   # stay <= v7x physical VMEM per TensorCore


def _rmsnorm(x, w):
    ms = jnp.mean(x * x, axis=-1, keepdims=True)
    return x * jax.lax.rsqrt(ms + EPS) * w


def _erf_approx(x):
    # Abramowitz & Stegun 7.1.26, |err| <= 1.5e-7 (erf primitive lowering in Mosaic
    # is not guaranteed).  The divide runs on the EUP via pl.reciprocal.
    a1, a2, a3, a4, a5 = 0.254829592, -0.284496736, 1.421413741, -1.453152027, 1.061405429
    p = 0.3275911
    ax = jnp.abs(x)
    t = pl.reciprocal(1.0 + p * ax, approx=True)
    poly = ((((a5 * t + a4) * t + a3) * t + a2) * t + a1) * t
    y = 1.0 - poly * jnp.exp(-ax * ax)
    return jnp.where(x >= 0, y, -y)


def _gelu_exact(x):
    # Matches torch.nn.functional.gelu (default, erf-based).
    return 0.5 * x * (1.0 + _erf_approx(x * (1.0 / math.sqrt(2.0))))


def _pick_tile(n, candidates):
    for c in candidates:
        if n % c == 0:
            return c
    return n


# --------------------------- fused transformer stack ----------------------------

def llama_layers_kernel(x_ref,
                        attn_norm_ref, wqkv_ref, wo_ref,
                        ffn_norm_ref, fc1_w_ref, fc1_b_ref, fc2_w_ref, fc2_b_ref,
                        post_norm_ref,
                        h_ref):
    Bc, S, D = h_ref.shape

    # Seed the VMEM-resident hidden state from the embeddings at the first layer.
    @pl.when(pl.program_id(1) == 0)
    def _():
        h_ref[...] = x_ref[...]

    x = h_ref[...]                                  # [Bc, S, D] f32, resident across L
    xf = x.reshape(Bc * S, D)                       # MXU-friendly M = Bc*S

    # --- attention sub-block ---
    xn = _rmsnorm(x, attn_norm_ref[0, 0]).reshape(Bc * S, D).astype(jnp.bfloat16)
    # Fused QKV projection; 1/sqrt(dim) already folded into the wq columns.
    qkv = jnp.dot(xn, wqkv_ref[0], preferred_element_type=jnp.float32)   # [Bc*S, 3D]
    q = qkv[:, 0 * D:1 * D].reshape(Bc, S, D)
    k = qkv[:, 1 * D:2 * D].reshape(Bc, S, D)
    v = qkv[:, 2 * D:3 * D].reshape(Bc, S, D)

    # q @ k^T batched over the batch chunk, contracting last dims on the MXU.
    scores = jnp.einsum('bqd,bkd->bqk', q.astype(jnp.bfloat16), k.astype(jnp.bfloat16),
                        preferred_element_type=jnp.float32)
    scores = scores - jnp.max(scores, axis=-1, keepdims=True)
    p = jnp.exp(scores)
    denom = jnp.sum(p, axis=-1, keepdims=True)
    ctx = jnp.einsum('bqk,bkd->bqd', p.astype(jnp.bfloat16), v.astype(jnp.bfloat16),
                     preferred_element_type=jnp.float32)
    # Normalize AFTER the PV matmul: O(S*D) multiplies instead of O(S^2).
    ctx = ctx * pl.reciprocal(denom, approx=True)
    attn_out = jnp.dot(ctx.reshape(Bc * S, D).astype(jnp.bfloat16), wo_ref[0],
                       preferred_element_type=jnp.float32)

    h = xf + attn_out                               # [Bc*S, D] f32

    # --- feed-forward sub-block ---
    hn = _rmsnorm(h, ffn_norm_ref[0, 0]).astype(jnp.bfloat16)
    ff1 = jnp.dot(hn, fc1_w_ref[0], preferred_element_type=jnp.float32) + fc1_b_ref[0, 0]
    ff2 = jnp.dot(_gelu_exact(ff1).astype(jnp.bfloat16), fc2_w_ref[0],
                  preferred_element_type=jnp.float32) + fc2_b_ref[0, 0]
    out = h + ff2

    # Shared Llama.norm applied after every layer (matches the reference forward loop).
    h_ref[...] = _rmsnorm(out, post_norm_ref[0]).reshape(Bc, S, D)


def run_llama_layers(x, stacked, post_norm_w, dim):
    B, S, D = x.shape
    L = stacked["wq"].shape[0]
    H = stacked["fc1_w"].shape[-1]

    # Host-side preprocessing (do once per model in production): fuse q/k/v into
    # one [D, 3D] weight and fold the 1/sqrt(dim) softmax scale into the q columns.
    inv_sqrt_dim = 1.0 / math.sqrt(dim)
    wq_scaled = (stacked["wq"].astype(jnp.float32) * inv_sqrt_dim).astype(jnp.bfloat16)
    wqkv = jnp.concatenate([wq_scaled, stacked["wk"], stacked["wv"]], axis=-1)  # [L, D, 3D]

    # Fold the whole batch into the block so each layer's weights stream at most
    # twice per forward; keep a 2-way leading "parallel" axis for v7x's 2 TCs.
    b_chunks = 2 if (B >= 2 and B % 2 == 0) else 1
    Bc = B // b_chunks

    def wspec(shape):
        # stacked per-layer tensor [L, *shape], one layer slab per grid step on the L axis
        return pl.BlockSpec((1,) + shape, lambda b, l: (l, 0, 0))

    in_specs = [
        pl.BlockSpec((Bc, S, D), lambda b, l: (b, 0, 0)),  # embeddings (read only at l==0)
        wspec((1, D)),        # attention_norm.weight     [L, 1, D]
        wspec((D, 3 * D)),    # fused [wq*scale | wk | wv]^T
        wspec((D, D)),        # wo^T
        wspec((1, D)),        # ffn_norm.weight
        wspec((D, H)),        # fc1.weight^T
        wspec((1, H)),        # fc1.bias
        wspec((H, D)),        # fc2.weight^T
        wspec((1, D)),        # fc2.bias
        pl.BlockSpec((1, D), lambda b, l: (0, 0)),         # shared Llama.norm weight
    ]

    # Explicit scoped-VMEM budget: 2x double-buffered per-layer weight slab +
    # 2x resident x/h blocks + intermediates + headroom, capped for v7x.
    slab = 2 * (3 * D * D + D * D + 2 * D * H) + 4 * (3 * D + H)       # bytes per layer
    act = 4 * Bc * S * D
    inter = 4 * Bc * S * (4 * D + 2 * H + 2 * S)
    vmem_bytes = min(_VMEM_CAP, max(16 << 20, 4 * slab + 4 * act + 2 * inter + (4 << 20)))

    return pl.pallas_call(
        llama_layers_kernel,
        out_shape=jax.ShapeDtypeStruct((B, S, D), jnp.float32),
        grid=(b_chunks, L),
        in_specs=in_specs,
        # Constant block index across L => hidden state stays VMEM-resident across layers.
        out_specs=pl.BlockSpec((Bc, S, D), lambda b, l: (b, 0, 0)),
        compiler_params=pltpu.CompilerParams(
            dimension_semantics=("parallel", "arbitrary"),
            vmem_limit_bytes=int(vmem_bytes)),
    )(x,
      stacked["attn_norm_w"], wqkv, stacked["wo"],
      stacked["ffn_norm_w"],
      stacked["fc1_w"], stacked["fc1_b"],
      stacked["fc2_w"], stacked["fc2_b"],
      post_norm_w)


# ------------------------------- output projection -------------------------------

def output_proj_kernel(h_ref, w_ref, o_ref):
    o_ref[...] = jnp.dot(h_ref[...], w_ref[...], preferred_element_type=jnp.float32)


def run_output_projection(h, w_out):
    B, S, D = h.shape
    V = w_out.shape[1]
    M = B * S

    # bf16 resident activations: half the VMEM footprint, no per-vocab-tile re-cast.
    h2 = h.reshape(M, D).astype(jnp.bfloat16)

    # Pad vocab up to a multiple of 128: lane-dense unmasked stores, bounded tiles.
    Vp = ((V + 127) // 128) * 128
    w_p = jnp.pad(w_out, ((0, 0), (0, Vp - V))) if Vp != V else w_out

    tv = _pick_tile(Vp, (512, 256, 128))             # multiple of 128 dividing Vp
    tm = _pick_tile(M, (256, 128, 64, 32, 16, 8))    # tile the M axis too (parallel)

    vmem_bytes = min(_VMEM_CAP,
                     max(16 << 20,
                         4 * (D * tv * 2) + 2 * (tm * D * 2) + 4 * (tm * tv * 4) + (4 << 20)))

    # TODO(synk): on v5e, emit bf16 logits here and upcast outside the kernel if
    # f32 logits are not strictly required (halves the dominant HBM writeback).
    out = pl.pallas_call(
        output_proj_kernel,
        out_shape=jax.ShapeDtypeStruct((M, Vp), jnp.float32),
        grid=(M // tm, Vp // tv),
        in_specs=[pl.BlockSpec((tm, D), lambda i, j: (i, 0)),   # activations resident across vocab tiles
                  pl.BlockSpec((D, tv), lambda i, j: (0, j))],  # weight tile streamed per step
        out_specs=pl.BlockSpec((tm, tv), lambda i, j: (i, j)),
        compiler_params=pltpu.CompilerParams(
            dimension_semantics=("parallel", "parallel"),
            vmem_limit_bytes=int(vmem_bytes)),
    )(h2, w_p)
    return out[:, :V].reshape(B, S, V)


def llama_forward(tokens, params):
    # Embedding lookup (pure gather) stays in plain JAX -- glue, not the hot path.
    h = jnp.take(params["emb"], tokens, axis=0)            # [B, S, D] f32
    dim = params["emb"].shape[1]
    h = run_llama_layers(h, params["stacked_layers"], params["post_norm_w"], dim)
    return run_output_projection(h, params["w_out"])        # [B, S, V]


# ----------------------------- reference (pure JAX) ------------------------------

def _ref_forward(tokens, params):
    hi = partial(jnp.einsum, precision=jax.lax.Precision.HIGHEST)
    dim = params["emb"].shape[1]
    h = jnp.take(params["emb"], tokens, axis=0)

    def rms(x, w):
        return x * jax.lax.rsqrt(jnp.mean(x * x, -1, keepdims=True) + EPS) * w

    st = params["stacked_layers"]
    f32 = lambda a: a.astype(jnp.float32)
    L = st["wq"].shape[0]
    for l in range(L):
        x = h
        xn = rms(x, st["attn_norm_w"][l, 0])
        q = hi("bsd,de->bse", xn, f32(st["wq"][l]))
        k = hi("bsd,de->bse", xn, f32(st["wk"][l]))
        v = hi("bsd,de->bse", xn, f32(st["wv"][l]))
        scores = hi("bqd,bkd->bqk", q, k) / (dim ** 0.5)
        attn = jax.nn.softmax(scores, axis=-1)
        ctx = hi("bqk,bkd->bqd", attn, v)
        h2 = x + hi("bsd,de->bse", ctx, f32(st["wo"][l]))
        hn = rms(h2, st["ffn_norm_w"][l, 0])
        ff = hi("bsh,hd->bsd",
                jax.nn.gelu(hi("bsd,dh->bsh", hn, f32(st["fc1_w"][l])) + st["fc1_b"][l, 0],
                            approximate=False),
                f32(st["fc2_w"][l])) + st["fc2_b"][l, 0]
        h = h2 + ff
        h = rms(h, params["post_norm_w"][0])
    return hi("bsd,dv->bsv", h, f32(params["w_out"]))


# ------------------------------------ main ---------------------------------------

if __name__ == "__main__":
    vocab_size, dim, n_layers = 64, 32, 2
    B, S = 2, 8

    key = jax.random.PRNGKey(0)
    keys = iter(jax.random.split(key, 64))

    def init(shape, scale=0.05):
        return scale * jax.random.normal(next(keys), shape, dtype=jnp.float32)

    layers = []
    for _ in range(n_layers):
        layers.append(dict(
            attn_norm_w=jnp.ones((1, dim), jnp.float32),
            wq=init((dim, dim)).astype(jnp.bfloat16),
            wk=init((dim, dim)).astype(jnp.bfloat16),
            wv=init((dim, dim)).astype(jnp.bfloat16),
            wo=init((dim, dim)).astype(jnp.bfloat16),
            ffn_norm_w=jnp.ones((1, dim), jnp.float32),
            fc1_w=init((dim, 4 * dim)).astype(jnp.bfloat16),
            fc1_b=init((1, 4 * dim)),
            fc2_w=init((4 * dim, dim)).astype(jnp.bfloat16),
            fc2_b=init((1, dim)),
        ))
    stacked = {k: jnp.stack([lp[k] for lp in layers], axis=0) for k in layers[0]}

    params = {
        "emb": init((vocab_size, dim), 1.0),
        "stacked_layers": stacked,
        "post_norm_w": jnp.ones((1, dim), jnp.float32),          # Llama.norm.weight (shared)
        "w_out": init((dim, vocab_size)).astype(jnp.bfloat16),   # output.weight^T
    }

    tokens = jax.random.randint(next(keys), (B, S), 0, vocab_size, dtype=jnp.int32)

    logits = jax.block_until_ready(llama_forward(tokens, params))
    ref = jax.block_until_ready(_ref_forward(tokens, params))

    max_err = float(jnp.max(jnp.abs(logits - ref)))
    if logits.shape != (B, S, vocab_size) or not (max_err < 1e-2):
        raise AssertionError(f"mismatch: shape={logits.shape}, max_err={max_err}")

    print("KERNEL_OK")
</pallas_src>

<mosaic_0001>
module attributes {stable_mosaic.version = 11 : i64} {
  func.func @llama_layers_kernel(%arg0: i32, %arg1: i32, %arg2: memref<1x8x32xf32, #tpu.memory_space<vmem>>, %arg3: memref<1x1x32xf32, #tpu.memory_space<vmem>>, %arg4: memref<1x32x96xbf16, #tpu.memory_space<vmem>>, %arg5: memref<1x32x32xbf16, #tpu.memory_space<vmem>>, %arg6: memref<1x1x32xf32, #tpu.memory_space<vmem>>, %arg7: memref<1x32x128xbf16, #tpu.memory_space<vmem>>, %arg8: memref<1x1x128xf32, #tpu.memory_space<vmem>>, %arg9: memref<1x128x32xbf16, #tpu.memory_space<vmem>>, %arg10: memref<1x1x32xf32, #tpu.memory_space<vmem>>, %arg11: memref<1x32xf32, #tpu.memory_space<vmem>>, %arg12: memref<1x8x32xf32, #tpu.memory_space<vmem>>) attributes {dimension_semantics = [#tpu.dimension_semantics<parallel>, #tpu.dimension_semantics<arbitrary>], iteration_bounds = array<i64: 2, 2>, scalar_prefetch = 0 : i64, scratch_operands = 0 : i64, tpu.core_type = #tpu.core_type<tc>, window_params = [{transform_indices = @transform_0, window_bounds = array<i64: 1, 8, 32>}, {transform_indices = @transform_1, window_bounds = array<i64: 1, 1, 32>}, {transform_indices = @transform_2, window_bounds = array<i64: 1, 32, 96>}, {transform_indices = @transform_3, window_bounds = array<i64: 1, 32, 32>}, {transform_indices = @transform_4, window_bounds = array<i64: 1, 1, 32>}, {transform_indices = @transform_5, window_bounds = array<i64: 1, 32, 128>}, {transform_indices = @transform_6, window_bounds = array<i64: 1, 1, 128>}, {transform_indices = @transform_7, window_bounds = array<i64: 1, 128, 32>}, {transform_indices = @transform_8, window_bounds = array<i64: 1, 1, 32>}, {pipeline_mode = #tpu.pipeline_mode<synchronous>, transform_indices = @transform_9, window_bounds = array<i64: 1, 32>}, {transform_indices = @transform_10, window_bounds = array<i64: 1, 8, 32>}]} {
    %c0_i32 = arith.constant 0 : i32
    %0 = arith.cmpi eq, %arg1, %c0_i32 : i32
    %1 = arith.extui %0 : i1 to i32
    %c0_i32_0 = arith.constant 0 : i32
    %2 = arith.cmpi ne, %1, %c0_i32_0 : i32
    scf.if %2 {
      %c0_62 = arith.constant 0 : index
      %c0_63 = arith.constant 0 : index
      %c0_64 = arith.constant 0 : index
      %143 = vector.load %arg2[%c0_62, %c0_63, %c0_64] : memref<1x8x32xf32, #tpu.memory_space<vmem>>, vector<1x8x32xf32>
      %c0_65 = arith.constant 0 : index
      %c0_66 = arith.constant 0 : index
      %c0_67 = arith.constant 0 : index
      %144 = vector.load %arg12[%c0_65, %c0_66, %c0_67] : memref<1x8x32xf32, #tpu.memory_space<vmem>>, vector<1x8x32xf32>
      tpu.vector_store %arg12[%c0_65, %c0_66, %c0_67], %143 {strides = array<i32>} : memref<1x8x32xf32, #tpu.memory_space<vmem>>, vector<1x8x32xf32>,
    } else {
    }
    %c0 = arith.constant 0 : index
    %c0_1 = arith.constant 0 : index
    %c0_2 = arith.constant 0 : index
    %3 = vector.load %arg12[%c0, %c0_1, %c0_2] : memref<1x8x32xf32, #tpu.memory_space<vmem>>, vector<1x8x32xf32>
    %4 = vector.shape_cast %3 : vector<1x8x32xf32> to vector<8x32xf32>
    %c0_3 = arith.constant 0 : index
    %c0_4 = arith.constant 0 : index
    %c0_5 = arith.constant 0 : index
    %5 = vector.load %arg3[%c0_3, %c0_4, %c0_5] : memref<1x1x32xf32, #tpu.memory_space<vmem>>, vector<1x1x32xf32>
    %6 = vector.shape_cast %5 : vector<1x1x32xf32> to vector<32xf32>
    %7 = arith.mulf %3, %3 : vector<1x8x32xf32>
    %cst = arith.constant dense<0.000000e+00> : vector<1x8xf32>
    %8 = vector.multi_reduction <add>, %7, %cst [2] : vector<1x8x32xf32> to vector<1x8xf32>
    %9 = vector.shape_cast %8 : vector<1x8xf32> to vector<1x8x1xf32>
    %cst_6 = arith.constant 3.200000e+01 : f32
    %10 = vector.broadcast %cst_6 : f32 to vector<1x8x1xf32>
    %11 = arith.divf %9, %10 : vector<1x8x1xf32>
    %cst_7 = arith.constant 9.99999997E-7 : f32
    %12 = vector.broadcast %cst_7 : f32 to vector<1x8x1xf32>
    %13 = arith.addf %11, %12 : vector<1x8x1xf32>
    %14 = math.rsqrt %13 : vector<1x8x1xf32>
    %15 = vector.broadcast %14 : vector<1x8x1xf32> to vector<1x8x32xf32>
    %16 = arith.mulf %3, %15 : vector<1x8x32xf32>
    %17 = vector.shape_cast %6 : vector<32xf32> to vector<1x1x32xf32>
    %18 = vector.broadcast %17 : vector<1x1x32xf32> to vector<1x8x32xf32>
    %19 = arith.mulf %16, %18 : vector<1x8x32xf32>
    %20 = vector.shape_cast %19 : vector<1x8x32xf32> to vector<8x32xf32>
    %21 = arith.truncf %20 : vector<8x32xf32> to vector<8x32xbf16>
    %c0_8 = arith.constant 0 : index
    %c0_9 = arith.constant 0 : index
    %c0_10 = arith.constant 0 : index
    %22 = vector.load %arg4[%c0_8, %c0_9, %c0_10] : memref<1x32x96xbf16, #tpu.memory_space<vmem>>, vector<1x32x96xbf16>
    %23 = vector.shape_cast %22 : vector<1x32x96xbf16> to vector<32x96xbf16>
    %cst_11 = arith.constant dense<0.000000e+00> : vector<8x96xf32>
    %24 = tpu.matmul %21, %23, %cst_11 {dimension_numbers = #tpu.dot_dimension_numbers<[1], [0], [0], [1], [0, 0, 1, 1], [], []>} : vector<8x32xbf16>, vector<32x96xbf16>, vector<8x96xf32> -> vector<8x96xf32>
    %25 = vector.extract_strided_slice %24 {offsets = [0, 0], sizes = [8, 32], strides = [1, 1]} : vector<8x96xf32> to vector<8x32xf32>
    %26 = vector.shape_cast %25 : vector<8x32xf32> to vector<1x8x32xf32>
    %27 = vector.extract_strided_slice %24 {offsets = [0, 32], sizes = [8, 32], strides = [1, 1]} : vector<8x96xf32> to vector<8x32xf32>
    %28 = vector.shape_cast %27 : vector<8x32xf32> to vector<1x8x32xf32>
    %29 = vector.extract_strided_slice %24 {offsets = [0, 64], sizes = [8, 32], strides = [1, 1]} : vector<8x96xf32> to vector<8x32xf32>
    %30 = vector.shape_cast %29 : vector<8x32xf32> to vector<1x8x32xf32>
    %31 = arith.truncf %26 : vector<1x8x32xf32> to vector<1x8x32xbf16>
    %32 = arith.truncf %28 : vector<1x8x32xf32> to vector<1x8x32xbf16>
    "tpu.trace_start"() <{level = 10 : i32, message = "bqd,bkd->bqk"}> : () -> ()
    %cst_12 = arith.constant dense<0.000000e+00> : vector<1x8x8xf32>
    %33 = tpu.matmul %31, %32, %cst_12 {dimension_numbers = #tpu.dot_dimension_numbers<[2], [2], [1], [1], [0, 0, 0, 1, 1, 1], [0], [0]>} : vector<1x8x32xbf16>, vector<1x8x32xbf16>, vector<1x8x8xf32> -> vector<1x8x8xf32>
    "tpu.trace_stop"() : () -> ()
    %cst_13 = arith.constant dense<0xFF800000> : vector<1x8xf32>
    %34 = vector.multi_reduction <maximumf>, %33, %cst_13 [2] : vector<1x8x8xf32> to vector<1x8xf32>
    %35 = vector.shape_cast %34 : vector<1x8xf32> to vector<1x8x1xf32>
    %36 = vector.broadcast %35 : vector<1x8x1xf32> to vector<1x8x8xf32>
    %37 = arith.subf %33, %36 : vector<1x8x8xf32>
    %38 = math.exp %37 : vector<1x8x8xf32>
    %cst_14 = arith.constant dense<0.000000e+00> : vector<1x8xf32>
    %39 = vector.multi_reduction <add>, %38, %cst_14 [2] : vector<1x8x8xf32> to vector<1x8xf32>
    %40 = vector.shape_cast %39 : vector<1x8xf32> to vector<1x8x1xf32>
    %41 = arith.truncf %38 : vector<1x8x8xf32> to vector<1x8x8xbf16>
    %42 = arith.truncf %30 : vector<1x8x32xf32> to vector<1x8x32xbf16>
    "tpu.trace_start"() <{level = 10 : i32, message = "bqk,bkd->bqd"}> : () -> ()
    %cst_15 = arith.constant dense<0.000000e+00> : vector<1x8x32xf32>
    %43 = tpu.matmul %41, %42, %cst_15 {dimension_numbers = #tpu.dot_dimension_numbers<[2], [1], [1], [2], [0, 0, 0, 1, 1, 2], [0], [0]>} : vector<1x8x8xbf16>, vector<1x8x32xbf16>, vector<1x8x32xf32> -> vector<1x8x32xf32>
    "tpu.trace_stop"() : () -> ()
    %44 = tpu.reciprocal %40 {approx = true} : vector<1x8x1xf32> -> vector<1x8x1xf32>
    %45 = vector.broadcast %44 : vector<1x8x1xf32> to vector<1x8x32xf32>
    %46 = arith.mulf %43, %45 : vector<1x8x32xf32>
    %47 = vector.shape_cast %46 : vector<1x8x32xf32> to vector<8x32xf32>
    %48 = arith.truncf %47 : vector<8x32xf32> to vector<8x32xbf16>
    %c0_16 = arith.constant 0 : index
    %c0_17 = arith.constant 0 : index
    %c0_18 = arith.constant 0 : index
    %49 = vector.load %arg5[%c0_16, %c0_17, %c0_18] : memref<1x32x32xbf16, #tpu.memory_space<vmem>>, vector<1x32x32xbf16>
    %50 = vector.shape_cast %49 : vector<1x32x32xbf16> to vector<32x32xbf16>
    %cst_19 = arith.constant dense<0.000000e+00> : vector<8x32xf32>
    %51 = tpu.matmul %48, %50, %cst_19 {dimension_numbers = #tpu.dot_dimension_numbers<[1], [0], [0], [1], [0, 0, 1, 1], [], []>} : vector<8x32xbf16>, vector<32x32xbf16>, vector<8x32xf32> -> vector<8x32xf32>
    %52 = arith.addf %4, %51 : vector<8x32xf32>
    %c0_20 = arith.constant 0 : index
    %c0_21 = arith.constant 0 : index
    %c0_22 = arith.constant 0 : index
    %53 = vector.load %arg6[%c0_20, %c0_21, %c0_22] : memref<1x1x32xf32, #tpu.memory_space<vmem>>, vector<1x1x32xf32>
    %54 = vector.shape_cast %53 : vector<1x1x32xf32> to vector<32xf32>
    %55 = arith.mulf %52, %52 : vector<8x32xf32>
    %cst_23 = arith.constant dense<0.000000e+00> : vector<8xf32>
    %56 = vector.multi_reduction <add>, %55, %cst_23 [1] : vector<8x32xf32> to vector<8xf32>
    %57 = vector.shape_cast %56 : vector<8xf32> to vector<8x1xf32>
    %cst_24 = arith.constant 3.200000e+01 : f32
    %58 = vector.broadcast %cst_24 : f32 to vector<8x1xf32>
    %59 = arith.divf %57, %58 : vector<8x1xf32>
    %cst_25 = arith.constant 9.99999997E-7 : f32
    %60 = vector.broadcast %cst_25 : f32 to vector<8x1xf32>
    %61 = arith.addf %59, %60 : vector<8x1xf32>
    %62 = math.rsqrt %61 : vector<8x1xf32>
    %63 = vector.broadcast %62 : vector<8x1xf32> to vector<8x32xf32>
    %64 = arith.mulf %52, %63 : vector<8x32xf32>
    %65 = vector.shape_cast %54 : vector<32xf32> to vector<1x32xf32>
    %66 = vector.broadcast %65 : vector<1x32xf32> to vector<8x32xf32>
    %67 = arith.mulf %64, %66 : vector<8x32xf32>
    %68 = arith.truncf %67 : vector<8x32xf32> to vector<8x32xbf16>
    %c0_26 = arith.constant 0 : index
    %c0_27 = arith.constant 0 : index
    %c0_28 = arith.constant 0 : index
    %69 = vector.load %arg7[%c0_26, %c0_27, %c0_28] : memref<1x32x128xbf16, #tpu.memory_space<vmem>>, vector<1x32x128xbf16>
    %70 = vector.shape_cast %69 : vector<1x32x128xbf16> to vector<32x128xbf16>
    %cst_29 = arith.constant dense<0.000000e+00> : vector<8x128xf32>
    %71 = tpu.matmul %68, %70, %cst_29 {dimension_numbers = #tpu.dot_dimension_numbers<[1], [0], [0], [1], [0, 0, 1, 1], [], []>} : vector<8x32xbf16>, vector<32x128xbf16>, vector<8x128xf32> -> vector<8x128xf32>
    %c0_30 = arith.constant 0 : index
    %c0_31 = arith.constant 0 : index
    %c0_32 = arith.constant 0 : index
    %72 = vector.load %arg8[%c0_30, %c0_31, %c0_32] : memref<1x1x128xf32, #tpu.memory_space<vmem>>, vector<1x1x128xf32>
    %73 = vector.shape_cast %72 : vector<1x1x128xf32> to vector<128xf32>
    %74 = vector.shape_cast %73 : vector<128xf32> to vector<1x128xf32>
    %75 = vector.broadcast %74 : vector<1x128xf32> to vector<8x128xf32>
    %76 = arith.addf %71, %75 : vector<8x128xf32>
    %cst_33 = arith.constant 5.000000e-01 : f32
    %77 = vector.broadcast %cst_33 : f32 to vector<8x128xf32>
    %78 = arith.mulf %77, %76 : vector<8x128xf32>
    %cst_34 = arith.constant 0.707106769 : f32
    %79 = vector.broadcast %cst_34 : f32 to vector<8x128xf32>
    %80 = arith.mulf %76, %79 : vector<8x128xf32>
    %81 = math.absf %80 : vector<8x128xf32>
    %cst_35 = arith.constant 0.327591091 : f32
    %82 = vector.broadcast %cst_35 : f32 to vector<8x128xf32>
    %83 = arith.mulf %82, %81 : vector<8x128xf32>
    %cst_36 = arith.constant 1.000000e+00 : f32
    %84 = vector.broadcast %cst_36 : f32 to vector<8x128xf32>
    %85 = arith.addf %84, %83 : vector<8x128xf32>
    %86 = tpu.reciprocal %85 {approx = true} : vector<8x128xf32> -> vector<8x128xf32>
    %cst_37 = arith.constant 1.06140542 : f32
    %87 = vector.broadcast %cst_37 : f32 to vector<8x128xf32>
    %88 = arith.mulf %87, %86 : vector<8x128xf32>
    %cst_38 = arith.constant -1.45315206 : f32
    %89 = vector.broadcast %cst_38 : f32 to vector<8x128xf32>
    %90 = arith.addf %88, %89 : vector<8x128xf32>
    %91 = arith.mulf %90, %86 : vector<8x128xf32>
    %cst_39 = arith.constant 1.42141378 : f32
    %92 = vector.broadcast %cst_39 : f32 to vector<8x128xf32>
    %93 = arith.addf %91, %92 : vector<8x128xf32>
    %94 = arith.mulf %93, %86 : vector<8x128xf32>
    %cst_40 = arith.constant -0.284496725 : f32
    %95 = vector.broadcast %cst_40 : f32 to vector<8x128xf32>
    %96 = arith.addf %94, %95 : vector<8x128xf32>
    %97 = arith.mulf %96, %86 : vector<8x128xf32>
    %cst_41 = arith.constant 0.254829586 : f32
    %98 = vector.broadcast %cst_41 : f32 to vector<8x128xf32>
    %99 = arith.addf %97, %98 : vector<8x128xf32>
    %100 = arith.mulf %99, %86 : vector<8x128xf32>
    %cst_42 = arith.constant 0.000000e+00 : f32
    %101 = vector.broadcast %cst_42 : f32 to vector<8x128xf32>
    %102 = arith.subf %101, %81 : vector<8x128xf32>
    %103 = arith.mulf %102, %81 : vector<8x128xf32>
    %104 = math.exp %103 : vector<8x128xf32>
    %105 = arith.mulf %100, %104 : vector<8x128xf32>
    %cst_43 = arith.constant 1.000000e+00 : f32
    %106 = vector.broadcast %cst_43 : f32 to vector<8x128xf32>
    %107 = arith.subf %106, %105 : vector<8x128xf32>
    %cst_44 = arith.constant 0.000000e+00 : f32
    %108 = vector.broadcast %cst_44 : f32 to vector<8x128xf32>
    %109 = arith.cmpf oge, %80, %108 : vector<8x128xf32>
    %cst_45 = arith.constant 0.000000e+00 : f32
    %110 = vector.broadcast %cst_45 : f32 to vector<8x128xf32>
    %111 = arith.subf %110, %107 : vector<8x128xf32>
    %112 = arith.select %109, %107, %111 : vector<8x128xi1>, vector<8x128xf32>
    %cst_46 = arith.constant 1.000000e+00 : f32
    %113 = vector.broadcast %cst_46 : f32 to vector<8x128xf32>
    %114 = arith.addf %113, %112 : vector<8x128xf32>
    %115 = arith.mulf %78, %114 : vector<8x128xf32>
    %116 = arith.truncf %115 : vector<8x128xf32> to vector<8x128xbf16>
    %c0_47 = arith.constant 0 : index
    %c0_48 = arith.constant 0 : index
    %c0_49 = arith.constant 0 : index
    %117 = vector.load %arg9[%c0_47, %c0_48, %c0_49] : memref<1x128x32xbf16, #tpu.memory_space<vmem>>, vector<1x128x32xbf16>
    %118 = vector.shape_cast %117 : vector<1x128x32xbf16> to vector<128x32xbf16>
    %cst_50 = arith.constant dense<0.000000e+00> : vector<8x32xf32>
    %119 = tpu.matmul %116, %118, %cst_50 {dimension_numbers = #tpu.dot_dimension_numbers<[1], [0], [0], [1], [0, 0, 1, 1], [], []>} : vector<8x128xbf16>, vector<128x32xbf16>, vector<8x32xf32> -> vector<8x32xf32>
    %c0_51 = arith.constant 0 : index
    %c0_52 = arith.constant 0 : index
    %c0_53 = arith.constant 0 : index
    %120 = vector.load %arg10[%c0_51, %c0_52, %c0_53] : memref<1x1x32xf32, #tpu.memory_space<vmem>>, vector<1x1x32xf32>
    %121 = vector.shape_cast %120 : vector<1x1x32xf32> to vector<32xf32>
    %122 = vector.shape_cast %121 : vector<32xf32> to vector<1x32xf32>
    %123 = vector.broadcast %122 : vector<1x32xf32> to vector<8x32xf32>
    %124 = arith.addf %119, %123 : vector<8x32xf32>
    %125 = arith.addf %52, %124 : vector<8x32xf32>
    %c0_54 = arith.constant 0 : index
    %c0_55 = arith.constant 0 : index
    %126 = vector.load %arg11[%c0_54, %c0_55] : memref<1x32xf32, #tpu.memory_space<vmem>>, vector<1x32xf32>
    %127 = vector.shape_cast %126 : vector<1x32xf32> to vector<32xf32>
    %128 = arith.mulf %125, %125 : vector<8x32xf32>
    %cst_56 = arith.constant dense<0.000000e+00> : vector<8xf32>
    %129 = vector.multi_reduction <add>, %128, %cst_56 [1] : vector<8x32xf32> to vector<8xf32>
    %130 = vector.shape_cast %129 : vector<8xf32> to vector<8x1xf32>
    %cst_57 = arith.constant 3.200000e+01 : f32
    %131 = vector.broadcast %cst_57 : f32 to vector<8x1xf32>
    %132 = arith.divf %130, %131 : vector<8x1xf32>
    %cst_58 = arith.constant 9.99999997E-7 : f32
    %133 = vector.broadcast %cst_58 : f32 to vector<8x1xf32>
    %134 = arith.addf %132, %133 : vector<8x1xf32>
    %135 = math.rsqrt %134 : vector<8x1xf32>
    %136 = vector.broadcast %135 : vector<8x1xf32> to vector<8x32xf32>
    %137 = arith.mulf %125, %136 : vector<8x32xf32>
    %138 = vector.shape_cast %127 : vector<32xf32> to vector<1x32xf32>
    %139 = vector.broadcast %138 : vector<1x32xf32> to vector<8x32xf32>
    %140 = arith.mulf %137, %139 : vector<8x32xf32>
    %141 = vector.shape_cast %140 : vector<8x32xf32> to vector<1x8x32xf32>
    %c0_59 = arith.constant 0 : index
    %c0_60 = arith.constant 0 : index
    %c0_61 = arith.constant 0 : index
    %142 = vector.load %arg12[%c0_59, %c0_60, %c0_61] : memref<1x8x32xf32, #tpu.memory_space<vmem>>, vector<1x8x32xf32>
    tpu.vector_store %arg12[%c0_59, %c0_60, %c0_61], %141 {strides = array<i32>} : memref<1x8x32xf32, #tpu.memory_space<vmem>>, vector<1x8x32xf32>,
    return
  }
  func.func @transform_0(%arg0: i32, %arg1: i32) -> (i32, i32, i32) {
    %c0_i32 = arith.constant 0 : i32
    %c0_i32_0 = arith.constant 0 : i32
    %c0_i32_1 = arith.constant 0 : i32
    return %arg0, %c0_i32, %c0_i32_0 : i32, i32, i32
  }
  func.func @transform_1(%arg0: i32, %arg1: i32) -> (i32, i32, i32) {
    %c0_i32 = arith.constant 0 : i32
    %c0_i32_0 = arith.constant 0 : i32
    %c0_i32_1 = arith.constant 0 : i32
    return %arg1, %c0_i32, %c0_i32_0 : i32, i32, i32
  }
  func.func @transform_2(%arg0: i32, %arg1: i32) -> (i32, i32, i32) {
    %c0_i32 = arith.constant 0 : i32
    %c0_i32_0 = arith.constant 0 : i32
    %c0_i32_1 = arith.constant 0 : i32
    return %arg1, %c0_i32, %c0_i32_0 : i32, i32, i32
  }
  func.func @transform_3(%arg0: i32, %arg1: i32) -> (i32, i32, i32) {
    %c0_i32 = arith.constant 0 : i32
    %c0_i32_0 = arith.constant 0 : i32
    %c0_i32_1 = arith.constant 0 : i32
    return %arg1, %c0_i32, %c0_i32_0 : i32, i32, i32
  }
  func.func @transform_4(%arg0: i32, %arg1: i32) -> (i32, i32, i32) {
    %c0_i32 = arith.constant 0 : i32
    %c0_i32_0 = arith.constant 0 : i32
    %c0_i32_1 = arith.constant 0 : i32
    return %arg1, %c0_i32, %c0_i32_0 : i32, i32, i32
  }
  func.func @transform_5(%arg0: i32, %arg1: i32) -> (i32, i32, i32) {
    %c0_i32 = arith.constant 0 : i32
    %c0_i32_0 = arith.constant 0 : i32
    %c0_i32_1 = arith.constant 0 : i32
    return %arg1, %c0_i32, %c0_i32_0 : i32, i32, i32
  }
  func.func @transform_6(%arg0: i32, %arg1: i32) -> (i32, i32, i32) {
    %c0_i32 = arith.constant 0 : i32
    %c0_i32_0 = arith.constant 0 : i32
    %c0_i32_1 = arith.constant 0 : i32
    return %arg1, %c0_i32, %c0_i32_0 : i32, i32, i32
  }
  func.func @transform_7(%arg0: i32, %arg1: i32) -> (i32, i32, i32) {
    %c0_i32 = arith.constant 0 : i32
    %c0_i32_0 = arith.constant 0 : i32
    %c0_i32_1 = arith.constant 0 : i32
    return %arg1, %c0_i32, %c0_i32_0 : i32, i32, i32
  }
  func.func @transform_8(%arg0: i32, %arg1: i32) -> (i32, i32, i32) {
    %c0_i32 = arith.constant 0 : i32
    %c0_i32_0 = arith.constant 0 : i32
    %c0_i32_1 = arith.constant 0 : i32
    return %arg1, %c0_i32, %c0_i32_0 : i32, i32, i32
  }
  func.func @transform_9(%arg0: i32, %arg1: i32) -> (i32, i32) {
    %c0_i32 = arith.constant 0 : i32
    %c0_i32_0 = arith.constant 0 : i32
    %c0_i32_1 = arith.constant 0 : i32
    return %c0_i32, %c0_i32_0 : i32, i32
  }
  func.func @transform_10(%arg0: i32, %arg1: i32) -> (i32, i32, i32) {
    %c0_i32 = arith.constant 0 : i32
    %c0_i32_0 = arith.constant 0 : i32
    %c0_i32_1 = arith.constant 0 : i32
    return %arg0, %c0_i32, %c0_i32_0 : i32, i32, i32
  }
}

</mosaic_0001>

<bundles_post_ra>
// kernel: tpu_custom_call.1
= control target key start
LH: loop header
LB: loop body
LE: loop exit
PB: predicated region body
PF: predicated region fallthrough
CT: control target
= control target key end

     0   :  { %s1610_s0 = inlined_call_operand.vmem [shape: f32[2,8,32], index: 0, kind: input, shape index: {}]   ;;  %s1611_s1 = inlined_call_operand.vmem [shape: f32[2,1,32], index: 1, kind: input, shape index: {}]   ;;  %s1612_s2 = inlined_call_operand.vmem [shape: bf16[2,32,96], index: 2, kind: input, shape index: {}]   ;;  %s1613_s3 = inlined_call_operand.vmem [shape: bf16[2,32,32], index: 3, kind: input, shape index: {}]   ;;  %s1614_s4 = inlined_call_operand.vmem [shape: f32[2,1,32], index: 4, kind: input, shape index: {}]   ;;  %s1615_s5 = inlined_call_operand.vmem [shape: bf16[2,32,128], index: 5, kind: input, shape index: {}]   ;;  %s1616_s6 = inlined_call_operand.vmem [shape: f32[2,1,128], index: 6, kind: input, shape index: {}]   ;;  %s1617_s7 = inlined_call_operand.vmem [shape: bf16[2,128,32], index: 7, kind: input, shape index: {}]   ;;  %s1618_s8 = inlined_call_operand.vmem [shape: f32[2,1,32], index: 8, kind: input, shape index: {}]   ;;  %s1619_s9 = inlined_call_operand.vmem [shape: f32[1,32], index: 9, kind: input, shape index: {}]   ;;  %s1620_s10 = inlined_call_operand.hbm [shape: f32[2,8,32], index: 10, kind: output, shape index: {}]  }
   0x1   :  { %1633 = sst [smem:[#allocation15_spill]] %s1610_s0 }
   0x2   :  { %1634 = sst [smem:[#allocation16_spill]] %s1619_s9 }
   0x3   :  { %1635 = sst [smem:[#allocation17_spill]] %s1620_s10 }
   0x4   :  { %15 = vsyncpa [#allocation3], 0 }
   0x5   :  { %17 = vsyncpa [#allocation3 + $0x1], 0  ;;  %s1378_s13 = smov 0   ;;  %s1380_s14 = smov 0  }
   0x6   :  { %s1382_s15 = smov 0   ;;  %s1384_s16 = smov 0  }
   0x7   :  { %s1386_s17 = smov 0   ;;  %s1388_s18 = smov 0  }
   0x8   :  { %s1390_s19 = smov 0   ;;  %s1392_s20 = smov 0  }
   0x9 LB: > { %1636 = sst [smem:[#allocation5_spill]] %s1290_s13  ;;  %s1030_s21 = sadd.s32 4294967295, %s1318_s20   ;;  %s1318_s20 = sphi %s1392_s20, %s23_s20   ;;  %s1314_s19 = sphi %s1390_s19, %s1664_s19   ;;  %s1310_s18 = sphi %s1388_s18, %s1663_s18   ;;  %s1306_s17 = sphi %s1386_s17, %s1662_s17   ;;  %s1302_s16 = sphi %s1384_s16, %s1661_s16   ;;  %s1298_s15 = sphi %s1382_s15, %s1660_s15   ;;  %s1294_s14 = sphi %s1380_s14, %s1666_s14   ;;  %s1290_s13 = sphi %s1378_s13, %s1665_s13  }
   0xa   : > { %1637 = sst [smem:[#allocation6_spill]] %s1298_s15  ;;  %s1031_s22 = sadd.s32 4294967294, %s1318_s20  }
   0xb   : > { %1638 = sst [smem:[#allocation7_spill]] %s1310_s18  ;;  %s32_s23 = sadd.s32 1, %s1310_s18 }
   0xc   : > { %1639 = sst [smem:[#allocation8_spill]] %s1314_s19  ;;  %p33_p0 = scmp.ge.s32.totalorder %s32_s23, 2 }
   0xd   : > { %1640 = sst [smem:[#allocation9_spill]] %s1318_s20  ;;  %s35_s24 = sadd.s32 1, %s1314_s19 }
   0xe   : > { %p307_p1 = scmp.ne.s32.totalorder %s1298_s15, %s1294_s14  ;;  %p308_p2 = scmp.eq.s32.totalorder %s1030_s21, 3 }
   0xf   : > { %s1668_s23 = smov (%p33_p0, %s32_s23), 0  ;;  %s1670_s24 = smov (!%p33_p0, %s35_s24), %s1314_s19 }
  0x10   : > { %1641 = sst [smem:[#allocation10_spill]] %s1668_s23  ;;  %p1427_p3 = por %p308_p2, %p307_p1 }
  0x11   : > { %p313_p4 = scmp.ne.s32.totalorder %s1294_s14, %s1290_s13  ;;  %p37_p5 = scmp.ge.s32.totalorder %s1670_s24, 2 }
  0x12   : > { %s1642_s25 = scalar_select %p1427_p3, 1, 0 }
  0x13   : > { %p314_p6 = scmp.eq.s32.totalorder %s1031_s22, 3  ;;  %p1034_p7 = scmp.ge.s32.totalorder %s1318_s20, 1 }
  0x14   : > { %1643 = sst [smem:[#allocation11_spill]] %s1642_s25  ;;  %p398_p8 = scmp.lt.s32.totalorder %s1318_s20, 5 }
  0x15   : > { %s1672_s24 = smov (%p37_p5, %s1670_s24), 0  ;;  %p1437_p9 = por %p314_p6, %p313_p4 }
  0x16   : > { %1644 = sst [smem:[#allocation12_spill]] %s1672_s24  ;;  %p399_p10 = pnand %p1034_p7, %p398_p8 }
  0x17   : > { %s1645_s26 = scalar_select %p1437_p9, 1, 0 }
  0x18   : > { %s294_s27 = ssub.s32 %s1314_s19, %s1672_s24  ;;  %s297_s28 = sadd.s32 1, %s1298_s15 }
  0x19   : > { %1646 = sst [smem:[#allocation13_spill]] %s1645_s26  ;;  %p295_p11 = scmp.eq.s32.totalorder %s294_s27, 0 }
  0x1a   : > { %402 = sbr.rel (%p399_p10) target bundleno = 1600 (0x640), region = 60  ;;  %s1624_s30 = sand.u32 (!%p399_p10), 1, %s1294_s14  }
  0x1b   : > { %s1445_s29 = scalar_select %p295_p11, %s1298_s15, %s297_s28  }
  0x1c   : > { %p467_p12 = scmp.lt.s32.totalorder (!%p399_p10), %s1306_s17, 1  ;;  %s1035_s11 = sshll.u32 (!%p399_p10), %s1624_s30, 3 }
  0x1d   : > { %1647 = sst [smem:[#allocation14_spill]] %s1445_s29  ;;  %p471_p13 = scmp.lt.s32.totalorder (!%p399_p10), %s1302_s16, 1 }
  0x1e   : > { %s1648_s0 = sld [smem:[#allocation15_spill]] (!%p399_p10)  ;;  %s1495_s25 = scalar_lea.vmem (!%p399_p10), [#allocation2], %s1035_s11 }
  0x1f   : > { %s468_s12 = scalar_select %p467_p12, %s1306_s17, 1 }
  0x20   : > { %s1454_s21 = scalar_select %p471_p13, %s1302_s16, 1 }
  0x21   : > { %s1036_s22 = sshll.u32 %s468_s12, 3  ;;  %p1045_p0 = scmp.ne.s32.totalorder %s1302_s16, 0 }
  0x22   : > { %s1111_s30 = sshll.u32 %s1454_s21, 4  ;;  %s494_s18 = scalar_lea.vmem %s1616_s6, %s1454_s21 }
  0x23   : > { %s478_s9 = scalar_lea.vmem %s1612_s2, %s1111_s30  ;;  %s1474_s12 = scalar_lea.vmem %s1613_s3, %s1111_s30 }
  0x24   : > { %s470_s24 = scalar_lea.vmem %s1648_s0, %s1036_s22  ;;  %s1479_s28 = scalar_lea.vmem %s1615_s5, %s1111_s30 }
  0x25   : > { %s1114_s15 = sshll.u32 %s1454_s21, 6  ;;  %s502_s13 = scalar_lea.vmem %s1618_s8, %s1454_s21 }
  0x26   : > { %s1493_s10 = scalar_lea.vmem %s1617_s7, %s1114_s15  ;;  %507 = sbr.rel (%p1045_p0) target bundleno = 45 (0x2d), region = 64 }
  0x2b   : > { %v508_v0 = vld [vmem:[%s470_s24] sm:$0xff]  ;;  %vm509_vm0 = vcmask 261120  }
  0x2c   : > { %510 = vst.msk [vmem:[%s1495_s25] sm:$0xff] %vm509_vm0, %v508_v0 }
  0x2d PF: > { %vm514_vm1 = vcmask 261120   ;;  %v1320_v4 = vmov 32.0   ;;  %v1116_v8 = vld [vmem:[%s478_s9 + $0x8] sm:$0xff]  ;;  %v1115_v10 = vld [vmem:[%s478_s9] sm:$0xff]  ;;  %s1649_s16 = scalar_lea.vmem %s1611_s1, %s1454_s21  ;;  %s1321_s24 = smov 96   ;;  %vm600_vm6 = vcmask 64512  }
  0x2e   : > { %1208 = vrcp.f32 %v1320_v4  ;;  %568 = vmatpush.bf16.msra.mxu1 %v1116_v8  ;;  %v1203_v22 = vld [vmem:[%s1649_s16] ss:$0 sm:$0xff]  ;;  %s1322_s26 = smov 64   ;;  %vm616_vm7 = vcmask 1043456   ;;  %v1118_v45 = vld [vmem:[%s1474_s12 + $0x8] sm:$0xff]  ;;  %s1651_s15 = sld [smem:[#allocation17_spill]] }
  0x2f   : > { %661 = vmatpush.bf16.msra.mxu3 %v1118_v45  ;;  %v1117_v46 = vld [vmem:[%s1474_s12] sm:$0xff]  ;;  %v1120_v58 = vld [vmem:[%s1479_s28 + $0x8] sm:$0xff]  ;;  %s1650_s12 = scalar_lea.vmem %s1614_s4, %s1454_s21  ;;  %s1108_s21 = sshll.u32 %s1306_s17, 3 }
  0x30   : > { %v1119_v59 = vld [vmem:[%s1479_s28] sm:$0xff]  ;;  %s1654_s9 = sld [smem:[#allocation16_spill]]  ;;  %s873_s16 = sshll.u32 %s1495_s25, 4  ;;  %s874_s16 = int_to_ptr.vmem [resolvable:$true] %s873_s16 }
  0x31   : > { %s1655_s17 = sand.u32 1, %s1294_s14  }
  0x32   : > { %569 = vmatpush.bf16.msra.mxu1 %v1115_v10  ;;  %v1128_v10 = vld [vmem:[%s1493_s10 + $0x38] sm:$0xff] }
  0x33   : > { %v1500_v1 = vld [vmem:[%s1495_s25] sm:$0xff]  ;;  %662 = vmatpush.bf16.msra.mxu3 %v1117_v46  ;;  %823 = vmatpush.bf16.msra.mxu0 %v1128_v10 }
  0x34   : > { %v513_v2 = vmul.f32 %v1500_v1, %v1500_v1  ;;  %v1209_v5 = vpop.eup %1208  ;;  %s1652_s29 = smov %s1651_s15 }
  0x35   : > { %v519_v6 = vmul.f32 32.0, %v1209_v5  ;;  %vm523_vm2 = vweird.f32 %v1209_v5  ;;  %s1244_s22 = scalar_lea.hbm %s1652_s29, 16 }
  0x36   : > { %v515_v3 = vsel %vm514_vm1, %v513_v2, 0.0 }
  0x37   : > { %516 = vadd.xlane.f32.xlu0 %v515_v3  ;;  %v520_v7 = vsub.f32 1.0, %v519_v6 }
  0x39   : > { %v521_v9 = vmul.f32 %v1209_v5, %v520_v7 }
  0x3b   : > { %v522_v11 = vadd.f32 %v1209_v5, %v521_v9 }
  0x3d   : > { %v1505_v12 = vsel %vm523_vm2, %v1209_v5, %v522_v11  ;;  %v1204_v5 = vld [vmem:[%s1650_s12] ss:$0 sm:$0xff]  ;;  %v1127_v11 = vld [vmem:[%s1493_s10 + $0x30] sm:$0xff] }
  0x3e   : > { %824 = vmatpush.bf16.msra.mxu0 %v1127_v11 }
  0xaa   : > { %v517_v13 = vpop.xlane.xlu0 %516 }
  0xab   : > { %v525_v14 = vmul.f32 %v1505_v12, %v517_v13  ;;  %v1126_v13 = vld [vmem:[%s1493_s10 + $0x28] sm:$0xff] }
  0xac   : > { %825 = vmatpush.bf16.msra.mxu0 %v1126_v13 }
  0xad   : > { %v526_v15 = vadd.f32 1e-06, %v525_v14  ;;  %v1125_v14 = vld [vmem:[%s1493_s10 + $0x20] sm:$0xff] }
  0xaf   : > { %1210 = vrsqrt.f32 %v526_v15  ;;  %vm533_vm4 = vweird.f32 %v526_v15 }
  0xb0   : > { %826 = vmatpush.bf16.msra.mxu0 %v1125_v14 }
  0xb5   : > { %v1211_v16 = vpop.eup %1210 }
  0xb6   : > { %v528_v17 = vmul.f32 %v1211_v16, %v526_v15  ;;  %vm534_vm3 = vweird.f32 %v1211_v16  ;;  %v1124_v15 = vld [vmem:[%s1493_s10 + $0x18] sm:$0xff] }
  0xb7   : > { %vm535_vm5 = vmor %vm533_vm4, %vm534_vm3  ;;  %827 = vmatpush.bf16.msra.mxu0 %v1124_v15 }
  0xb8   : > { %v529_v18 = vmul.f32 %v1211_v16, %v528_v17  ;;  %v1123_v17 = vld [vmem:[%s1493_s10 + $0x10] sm:$0xff] }
  0xba   : > { %v530_v19 = vmul.f32 0.5, %v529_v18 }
  0xbb   : > { %828 = vmatpush.bf16.msra.mxu0 %v1123_v17 }
  0xbc   : > { %v531_v20 = vsub.f32 1.5, %v530_v19 }
  0xbe   : > { %v532_v21 = vmul.f32 %v1211_v16, %v531_v20 }
  0xc0   : > { %v536_v23 = vsel %vm535_vm5, %v1211_v16, %v532_v21  ;;  %v1205_v16 = vld [vmem:[%s494_s18] ss:$0 sm:$0xff]  ;;  %v1122_v21 = vld [vmem:[%s1493_s10 + $0x8] sm:$0xff] }
  0xc1   : > { %v537_v24 = vmul.f32 %v536_v23, %v1500_v1  ;;  %829 = vmatpush.bf16.msra.mxu0 %v1122_v21 }
  0xc3   : > { %v541_v25 = vmul.f32 %v1203_v22, %v537_v24  ;;  %v1121_v24 = vld [vmem:[%s1493_s10] sm:$0xff] }
  0xc5   : > { %v542_v26 = vpack.c.bf16 %v541_v25, %v541_v25  ;;  %830 = vmatpush.bf16.msra.mxu0 %v1121_v24 }
  0xc7   : > { %1054 = vmatmul.msk.bf16.vlgmr.msra.gmra.mxu1 %vm514_vm1, %v542_v26 }
 0x144   : > { %v571_v27 = vpop.f32.mrf.mxu1 }
 0x145   : > { %v575_v28 = vpack.c.bf16 %v571_v27, %v571_v27 }
 0x147   : > { %v577_v29 = vunpack.c.l.b16 %v575_v28 }
 0x149   : > { %v578_v30 = vpack.c.b16 %v577_v29, %v577_v29 }
 0x14b   : > { %579 = vrot.lane.b32.xlu0 %v578_v30, %s1321_s24 }
 0x14c   : > { %v573_v31 = vpop.f32.mrf.mxu1 }
 0x1bd   : > { %v580_v32 = vpop.permute.xlu0 %579 }
 0x1be   : > { %v585_v33 = vsel %vm514_vm1, %v580_v32, 0 }
 0x1bf   : > { %594 = vmatpush.bf16.xpose.msrb.mxu1 %v585_v33 }
 0x1c6   : > { %1055 = vmatmul.msk.bf16.vlgmr.msrb.gmra.mxu1 %vm514_vm1, %v575_v28 }
 0x243   : > { %v596_v34 = vpop.f32.mrf.mxu1 }
 0x244   : > { %v601_v35 = vsel %vm600_vm6, %v596_v34, -inf }
 0x245   : > { %602 = vmax.xlane.f32.xlu1 %v601_v35 }
 0x24b   : > { %v598_v36 = vpop.f32.mrf.mxu1 }
 0x25e   : > { %611 = vrot.lane.b32.xlu1 %v578_v30, %s1322_s26  ;;  %s861_s26 = scalar_lea.sflag [#allocation3], %s1655_s17 }
 0x2b8   : > { %v603_v37 = vpop.xlane.xlu1 %602 }
 0x2b9   : > { %v604_v38 = vsub.f32 %v596_v34, %v603_v37 }
 0x2bb   : > { %v605_v39 = vmul.f32 1.442695, %v604_v38 }
 0x2bd   : > { %1212 = vpow2.f32 %v605_v39 }
 0x2c3   : > { %v1213_v40 = vpop.eup %1212 }
 0x2c4   : > { %v607_v41 = vsel %vm600_vm6, %v1213_v40, 0.0  ;;  %v610_v44 = vpack.c.bf16 %v1213_v40, %v1213_v40 }
 0x2c5   : > { %608 = vadd.xlane.f32.xlu2 %v607_v41 }
 0x2d0   : > { %v612_v42 = vpop.permute.xlu1 %611 }
 0x2d1   : > { %v618_v43 = vsel %vm616_vm7, %v612_v42, 0 }
 0x2d2   : > { %627 = vmatpush.bf16.msra.mxu2 %v618_v43 }
 0x2d5   : > { %1056 = vmatmul.msk.bf16.vlgmr.msra.gmra.mxu2 %vm600_vm6, %v610_v44 }
 0x2d6   : > { %721 = vmatpush.bf16.msrb.mxu2 %v1120_v58 }
 0x2da   : > { %722 = vmatpush.bf16.msrb.mxu2 %v1119_v59 }
 0x338   : > { %v609_v47 = vpop.xlane.xlu2 %608 }
 0x339   : > { %1214 = vrcp.f32 %v609_v47 }
 0x33f   : > { %v1215_v48 = vpop.eup %1214 }
 0x358   : > { %v629_v49 = vpop.f32.mrf.mxu2 }
 0x359   : > { %v634_v50 = vmul.f32 %v1215_v48, %v629_v49  ;;  %v1206_v49 = vld [vmem:[%s502_s13] ss:$0 sm:$0xff]  ;;  %s871_s13 = scalar_lea.hbm %s1651_s15, %s1108_s21 }
 0x35a   : > { %s875_s24 = sshll.u32 %s871_s13, 4  ;;  %s876_s24 = int_to_ptr.hbm [resolvable:$true] %s875_s24 }
 0x35b   : > { %v635_v51 = vpack.c.bf16 %v634_v50, %v634_v50  ;;  %s1238_s30 = sshra.s32 %s876_s24, 4  ;;  %s1239_s30 = int_to_ptr.hbm [resolvable:$true] %s1238_s30 }
 0x35c   : > { %s1240_s11 = scalar_lea.hbm %s1239_s30, 8  ;;  %p1245_p5 = scmp.lt.s32.totalorder %s1239_s30, %s1652_s29 }
 0x35d   : > { %1065 = vmatmul.msk.bf16.vlgmr.msra.gmra.mxu3 %vm514_vm1, %v635_v51  ;;  %p1241_p1 = scmp.ne.s32.totalorder %s1239_s30, %s1240_s11  ;;  %p1246_p6 = scmp.lt.s32.totalorder %s1244_s22, %s1240_s11 }
 0x35f   : > { %p1242_p2 = pnand %p1241_p1, %p1427_p3  ;;  %p1247_p7 = por %p1246_p6, %p1245_p5 }
 0x360   : > { %v631_v52 = vpop.f32.mrf.mxu2 }
 0x361   : > { %p1243_p4 = pneg %p1242_p2 }
 0x363   : > { %p1248_p8 = pnand %p1247_p7, %p1243_p4 }
 0x3e0   : > { %v664_v53 = vpop.f32.mrf.mxu3 }
 0x3e1   : > { %v1524_v54 = vadd.f32 %v664_v53, %v1500_v1 }
 0x3e3   : > { %v670_v55 = vmul.f32 %v1524_v54, %v1524_v54 }
 0x3e5   : > { %v671_v56 = vsel %vm514_vm1, %v670_v55, 0.0 }
 0x3e6   : > { %672 = vadd.xlane.f32.xlu2 %v671_v56 }
 0x3e8   : > { %v666_v57 = vpop.f32.mrf.mxu3 }
 0x459   : > { %v673_v60 = vpop.xlane.xlu2 %672 }
 0x45a   : > { %v674_v61 = vmul.f32 %v673_v60, %v1505_v12 }
 0x45c   : > { %v675_v62 = vadd.f32 1e-06, %v674_v61 }
 0x45e   : > { %1216 = vrsqrt.f32 %v675_v62  ;;  %vm682_vm9 = vweird.f32 %v675_v62 }
 0x464   : > { %v1217_v63 = vpop.eup %1216 }
 0x465   : > { %v677_v0 = vmul.f32 %v1217_v63, %v675_v62  ;;  %vm683_vm8 = vweird.f32 %v1217_v63 }
 0x466   : > { %vm684_vm10 = vmor %vm682_vm9, %vm683_vm8 }
 0x467   : > { %v678_v1 = vmul.f32 %v1217_v63, %v677_v0 }
 0x469   : > { %v679_v2 = vmul.f32 0.5, %v678_v1 }
 0x46b   : > { %v680_v3 = vsub.f32 1.5, %v679_v2 }
 0x46d   : > { %v681_v4 = vmul.f32 %v1217_v63, %v680_v3 }
 0x46f   : > { %v685_v6 = vsel %vm684_vm10, %v1217_v63, %v681_v4 }
 0x470   : > { %v686_v7 = vmul.f32 %v685_v6, %v1524_v54 }
 0x472   : > { %v690_v8 = vmul.f32 %v1204_v5, %v686_v7 }
 0x474   : > { %v691_v9 = vpack.c.bf16 %v690_v8, %v690_v8 }
 0x476   : > { %1074 = vmatmul.msk.bf16.vlgmr.msrb.gmra.mxu2 %vm514_vm1, %v691_v9 }
 0x4f9   : > { %v724_v18 = vpop.f32.mrf.mxu2 }
 0x4fa   : > { %v725_v19 = vadd.f32 %v1205_v16, %v724_v18 }
 0x4fc   : > { %v729_v20 = vmul.f32 0.70710677, %v725_v19  ;;  %v728_v45 = vmul.f32 0.5, %v725_v19 }
 0x4fe   : > { %v730_v22 = vand.u32 2147483647, %v729_v20  ;;  %vm749_vm11 = vcmp.ge.f32.partialorder %v729_v20, 0.0 }
 0x500   : > { %v731_v23 = vmul.f32 0.3275911, %v730_v22  ;;  %v743_v28 = vsub.f32 0.0, %v730_v22 }
 0x501   : > { %v726_v25 = vpop.f32.mrf.mxu2 }
 0x502   : > { %v732_v26 = vadd.f32 1.0, %v731_v23  ;;  %v744_v31 = vmul.f32 %v743_v28, %v730_v22 }
 0x504   : > { %1218 = vrcp.f32 %v732_v26  ;;  %v745_v34 = vmul.f32 1.442695, %v744_v31 }
 0x506   : > { %1220 = vpow2.f32 %v745_v34 }
 0x50a   : > { %v1219_v27 = vpop.eup %1218 }
 0x50b   : > { %v734_v29 = vmul.f32 1.0614054, %v1219_v27 }
 0x50c   : > { %v1221_v40 = vpop.eup %1220 }
 0x50d   : > { %v735_v30 = vadd.f32 -1.4531521, %v734_v29 }
 0x50f   : > { %v736_v32 = vmul.f32 %v1219_v27, %v735_v30 }
 0x511   : > { %v737_v33 = vadd.f32 1.4214138, %v736_v32 }
 0x513   : > { %v738_v35 = vmul.f32 %v1219_v27, %v737_v33 }
 0x515   : > { %v739_v36 = vadd.f32 -0.28449672, %v738_v35 }
 0x517   : > { %v740_v37 = vmul.f32 %v1219_v27, %v739_v36 }
 0x519   : > { %v741_v38 = vadd.f32 0.2548296, %v740_v37 }
 0x51b   : > { %v742_v39 = vmul.f32 %v1219_v27, %v741_v38 }
 0x51d   : > { %v747_v41 = vmul.f32 %v1221_v40, %v742_v39 }
 0x51f   : > { %v748_v42 = vsub.f32 1.0, %v747_v41 }
 0x521   : > { %v750_v43 = vsub.f32 0.0, %v748_v42 }
 0x523   : > { %v751_v44 = vsel %vm749_vm11, %v748_v42, %v750_v43 }
 0x524   : > { %v752_v46 = vadd.f32 1.0, %v751_v44 }
 0x526   : > { %v753_v47 = vmul.f32 %v752_v46, %v728_v45 }
 0x528   : > { %v754_v48 = vpack.c.bf16 %v753_v47, %v753_v47 }
 0x52a   : > { %831 = vmatmul.bf16.vlgmr.msra.gmra.mxu0 %v754_v48 }
 0x5a7   : > { %v832_v50 = vpop.f32.mrf.mxu0 }
 0x5a8   : > { %v833_v51 = vadd.f32 %v1206_v49, %v832_v50 }
 0x5aa   : > { %v836_v52 = vadd.f32 %v833_v51, %v1524_v54 }
 0x5ac   : > { %v838_v53 = vmul.f32 %v836_v52, %v836_v52 }
 0x5ae   : > { %v839_v55 = vsel %vm514_vm1, %v838_v53, 0.0 }
 0x5af   : > { %v834_v56 = vpop.f32.mrf.mxu0  ;;  %840 = vadd.xlane.f32.xlu2 %v839_v55 }
 0x622   : > { %v841_v57 = vpop.xlane.xlu2 %840 }
 0x623   : > { %v842_v58 = vmul.f32 %v841_v57, %v1505_v12  ;;  %v1207_v12 = vld [vmem:[%s1654_s9] ss:$0 sm:$0xff] }
 0x625   : > { %v843_v59 = vadd.f32 1e-06, %v842_v58 }
 0x627   : > { %1222 = vrsqrt.f32 %v843_v59  ;;  %vm850_vm13 = vweird.f32 %v843_v59 }
 0x62d   : > { %v1223_v60 = vpop.eup %1222 }
 0x62e   : > { %v845_v61 = vmul.f32 %v1223_v60, %v843_v59  ;;  %vm851_vm12 = vweird.f32 %v1223_v60 }
 0x62f   : > { %vm852_vm14 = vmor %vm850_vm13, %vm851_vm12 }
 0x630   : > { %v846_v62 = vmul.f32 %v1223_v60, %v845_v61 }
 0x632   : > { %v847_v63 = vmul.f32 0.5, %v846_v62 }
 0x634   : > { %v848_v0 = vsub.f32 1.5, %v847_v63 }
 0x636   : > { %v849_v54 = vmul.f32 %v1223_v60, %v848_v0 }
 0x638   : > { %v853_v1 = vsel %vm852_vm14, %v1223_v60, %v849_v54 }
 0x639   : > { %v854_v2 = vmul.f32 %v853_v1, %v836_v52 }
 0x63b   : > { %v858_v3 = vmul.f32 %v1207_v12, %v854_v2 }
 0x63d   : > { %859 = vst.msk [vmem:[%s1495_s25] sm:$0xff] %vm514_vm1, %v858_v3 }
 0x63e   : > { %1251 = shalt.err (!%p1248_p8)
}
 0x63f   : > { %1129 = dma.vmem_to_hbm [thread:$0]  (%p1427_p3), %s874_s16, 128, %s876_s24, %s861_s26  }
 0x640 PF: > { %s1656_s25 = sld [smem:[#allocation9_spill]] }
 0x641   : > { %s1657_s21 = sld [smem:[#allocation5_spill]] }
 0x646   : > { %p1135_p10 = scmp.ge.s32.totalorder %s1656_s25, 2 }
 0x647   : > { %s887_s23 = sand.u32 1, %s1657_s21  }
 0x648   : > { %p1132_p11 = pnand %p1135_p10, %p1437_p9  ;;  %s888_s15 = scalar_lea.sflag [#allocation3], %s887_s23 }
 0x64a   : > { %p1133_p12 = pneg %p1132_p11 }
 0x64c   : > { %1285 = dma.done.wait (%p1133_p12), %s888_s15, 128  }
 0x64d   : > { %1287 = vsyncadd (%p1133_p12), %s888_s15, 4294967168  ;;  %s23_s20 = sadd.s32 1, %s1656_s25   ;;  %s1659_s10 = sld [smem:[#allocation6_spill]] }
 0x64e   : > { %p20_p13 = scmp.ge.s32.totalorder %s23_s20, 6   ;;  %s1660_s15 = sld [smem:[#allocation14_spill]] }
 0x64f   : > { %s1661_s16 = sld [smem:[#allocation7_spill]]  ;;  %s1665_s13 = smov %s1294_s14 }
 0x650   : > { %s1662_s17 = sld [smem:[#allocation8_spill]]  ;;  %22 = sbr.rel (!%p20_p13) target bundleno = 9 (0x9), region = 123 }
 0x651   : > { %s1663_s18 = sld [smem:[#allocation10_spill]] }
 0x652   : > { %s1664_s19 = sld [smem:[#allocation12_spill]] }
 0x653   : > { %s1666_s14 = smov %s1659_s10 }
 0x655   :  { %894 = vsyncpa [#allocation3], 1 }
 0x656   :  { %896 = vsyncpa [#allocation3 + $0x1], 1 }

</bundles_post_ra>
